<compile_context>
chip_gen: v7x
topology: tpu7x:2x2x1
jax: 0.10.0
libtpu: 0.0.40
codegen_flags: <defaults>
</compile_context>

<pallas_src>
import jax
import jax.numpy as jnp
from jax.experimental import pallas as pl
from jax.experimental.pallas import tpu as pltpu


def classifier2_kernel(x_ref, w_ref, b_ref, y_ref):
    # x_ref: [block_b, D] f32 (pipelined HBM stream)
    # w_ref: [D, 1] f32 (VMEM-resident), b_ref: [1] f32 in SMEM
    y = jnp.dot(
        x_ref[...],
        w_ref[...],
        preferred_element_type=jnp.float32,
        precision=jax.lax.Precision.HIGHEST,
    )                                    # [block_b, 1], MXU, f32 accumulate
    y_ref[...] = y + b_ref[0]            # scalar bias from SMEM


def classifier2_forward(x, params, *, block_b=None, target_tile_bytes=4 << 20):
    """x: [B, inputSize] f32.  params = (w [1, D], b [1]).  Returns (y [B, 1], None)."""
    w, b = params
    B, D = x.shape
    itemsize = jnp.dtype(x.dtype).itemsize
    bytes_per_row = D * itemsize

    if block_b is None:
        # Size the streamed X tile in bytes (multi-MiB -> near HBM roofline on
        # v5e/v6e/v7x; per-grid-step overhead ~0.35us).  Cap the per-buffer size
        # so 2 pipeline buffers stay comfortably inside v7x's 64 MiB VMEM.
        tile_bytes = min(target_tile_bytes, 12 << 20)
        block_b = max(1, tile_bytes // bytes_per_row)

    if B <= 8:
        block_b = B                                   # full-dim block is always legal
    else:
        block_b = max(8, (min(block_b, B) // 8) * 8)  # sublane-aligned, <= B

    nb = pl.cdiv(B, block_b)
    # NOTE(v7x): for large B prefer nb >= 2 (even) so both TensorCores get work;
    # the byte-sized default tile already yields many tiles for large batches.

    w_col = w.reshape(D, 1).astype(jnp.float32)       # [D, 1], resident in VMEM
    b_vec = b.reshape(1).astype(jnp.float32)          # [1],   scalar in SMEM

    # VMEM budget: 2 pipeline buffers for X + output blocks + weight + margin.
    x_tile_bytes = block_b * bytes_per_row
    vmem_need = 2 * x_tile_bytes + 2 * block_b * 4 + D * 4 + (2 << 20)
    cp_kwargs = {"dimension_semantics": ("parallel",)}
    if vmem_need > (16 << 20):                        # v5e default scoped limit
        cp_kwargs["vmem_limit_bytes"] = int(vmem_need)

    y = pl.pallas_call(
        classifier2_kernel,
        out_shape=jax.ShapeDtypeStruct((B, 1), jnp.float32),
        grid_spec=pltpu.PrefetchScalarGridSpec(
            num_scalar_prefetch=0,
            grid=(nb,),
            in_specs=[
                pl.BlockSpec((block_b, D), lambda i: (i, 0)),        # X stream, pipelined
                pl.BlockSpec((D, 1), lambda i: (0, 0)),              # weight, resident
                pl.BlockSpec(memory_space=pltpu.MemorySpace.SMEM),   # bias scalar
            ],
            out_specs=pl.BlockSpec((block_b, 1), lambda i: (i, 0)),
        ),
        compiler_params=pltpu.CompilerParams(**cp_kwargs),
    )(x, w_col, b_vec)

    return y, None                                    # module returns (y, None)


def init_params(key, input_size):
    """Mimic the PyTorch init: kaiming_normal weight [1, inputSize], zero bias."""
    # kaiming_normal (fan_in mode, a=0): std = sqrt(2 / fan_in)
    w = jax.random.normal(key, (1, input_size), jnp.float32) * (2.0 / input_size) ** 0.5
    b = jnp.zeros((1,), jnp.float32)                  # init.constant(bias, 0)
    return w, b


def reference_forward(x, params):
    """Pure-JAX f32 reference."""
    w, b = params
    y = jnp.dot(x, w.T, precision=jax.lax.Precision.HIGHEST) + b
    return y, None


if __name__ == "__main__":
    key = jax.random.PRNGKey(0)
    kx, kp = jax.random.split(key)

    B, INPUT_SIZE = 200, 32
    x = jax.random.normal(kx, (B, INPUT_SIZE), jnp.float32)
    params = init_params(kp, INPUT_SIZE)

    # Default byte-sized tile: single grid step for this small problem.
    y, none_out = classifier2_forward(x, params)
    jax.block_until_ready(y)

    # Force a multi-tile grid with a ragged last tile to exercise the pipeline
    # and Pallas edge-block handling.
    y_tiled, _ = classifier2_forward(x, params, block_b=64)
    jax.block_until_ready(y_tiled)

    y_ref, _ = reference_forward(x, params)
    assert y.shape == (B, 1), f"bad shape {y.shape}"
    assert none_out is None
    assert jnp.allclose(y, y_ref, atol=1e-4, rtol=1e-4), "y mismatch (single tile)"
    assert jnp.allclose(y_tiled, y_ref, atol=1e-4, rtol=1e-4), "y mismatch (multi tile)"

    print("KERNEL_OK")
</pallas_src>

<mosaic_0001>
module attributes {stable_mosaic.version = 11 : i64} {
  func.func @classifier2_kernel(%arg0: i32, %arg1: memref<200x32xf32, #tpu.memory_space<vmem>>, %arg2: memref<32x1xf32, #tpu.memory_space<vmem>>, %arg3: memref<1xf32, #tpu.memory_space<smem>>, %arg4: memref<200x1xf32, #tpu.memory_space<vmem>>) attributes {dimension_semantics = [#tpu.dimension_semantics<parallel>], iteration_bounds = array<i64: 1>, scalar_prefetch = 0 : i64, scratch_operands = 0 : i64, tpu.core_type = #tpu.core_type<tc>, window_params = [{transform_indices = @transform_0, window_bounds = array<i64: 200, 32>}, {pipeline_mode = #tpu.pipeline_mode<synchronous>, transform_indices = @transform_1, window_bounds = array<i64: 32, 1>}, {transform_indices = @transform_2, window_bounds = array<i64: 1>}, {transform_indices = @transform_3, window_bounds = array<i64: 200, 1>}]} {
    %c0 = arith.constant 0 : index
    %c0_0 = arith.constant 0 : index
    %0 = vector.load %arg1[%c0, %c0_0] : memref<200x32xf32, #tpu.memory_space<vmem>>, vector<200x32xf32>
    %c0_1 = arith.constant 0 : index
    %c0_2 = arith.constant 0 : index
    %1 = vector.load %arg2[%c0_1, %c0_2] : memref<32x1xf32, #tpu.memory_space<vmem>>, vector<32x1xf32>
    %cst = arith.constant dense<0.000000e+00> : vector<200x1xf32>
    %2 = tpu.matmul %0, %1, %cst {dimension_numbers = #tpu.dot_dimension_numbers<[1], [0], [0], [1], [0, 0, 1, 1], [], []>, precision = #tpu.contract_precision<fp32>} : vector<200x32xf32>, vector<32x1xf32>, vector<200x1xf32> -> vector<200x1xf32>
    %c0_3 = arith.constant 0 : index
    %3 = memref.load %arg3[%c0_3] : memref<1xf32, #tpu.memory_space<smem>>
    %4 = vector.broadcast %3 : f32 to vector<200x1xf32>
    %5 = arith.addf %2, %4 : vector<200x1xf32>
    %c0_4 = arith.constant 0 : index
    %c0_5 = arith.constant 0 : index
    %6 = vector.load %arg4[%c0_4, %c0_5] : memref<200x1xf32, #tpu.memory_space<vmem>>, vector<200x1xf32>
    tpu.vector_store %arg4[%c0_4, %c0_5], %5 {strides = array<i32>} : memref<200x1xf32, #tpu.memory_space<vmem>>, vector<200x1xf32>,
    return
  }
  func.func @transform_0(%arg0: i32) -> (i32, i32) {
    %c0_i32 = arith.constant 0 : i32
    %c0_i32_0 = arith.constant 0 : i32
    return %arg0, %c0_i32 : i32, i32
  }
  func.func @transform_1(%arg0: i32) -> (i32, i32) {
    %c0_i32 = arith.constant 0 : i32
    %c0_i32_0 = arith.constant 0 : i32
    %c0_i32_1 = arith.constant 0 : i32
    return %c0_i32, %c0_i32_0 : i32, i32
  }
  func.func @transform_2(%arg0: i32) -> i32 {
    %c0_i32 = arith.constant 0 : i32
    %c0_i32_0 = arith.constant 0 : i32
    return %c0_i32 : i32
  }
  func.func @transform_3(%arg0: i32) -> (i32, i32) {
    %c0_i32 = arith.constant 0 : i32
    %c0_i32_0 = arith.constant 0 : i32
    return %arg0, %c0_i32 : i32, i32
  }
}

</mosaic_0001>

<bundles_post_ra>
// kernel: tpu_custom_call.1
= control target key start
LH: loop header
LB: loop body
LE: loop exit
PB: predicated region body
PF: predicated region fallthrough
CT: control target
= control target key end

     0   :  { %vm46_vm0 = vcmask 261120   ;;  %v3574_v0 = vmov 0.0|0.0   ;;  %vm2631_vm1 = vmmov 0   ;;  %v2632_v8 = vmov 0.0   ;;  %s3570_s1 = inlined_call_operand.vmem [shape: f32[32,1], index: 1, kind: input, shape index: {}]   ;;  %s3571_s0 = inlined_call_operand.vmem [shape: f32[200,32], index: 0, kind: input, shape index: {}]   ;;  %s3572_s2 = inlined_call_operand.<no memory space> [shape: f32[1], index: 2, kind: input, shape index: {}]   ;;  %s3573_s3 = inlined_call_operand.vmem [shape: f32[200,1], index: 3, kind: output, shape index: {}]  }
   0x1   :  { %2341 = vmatprep.subr.bf16.mxu1 %v3574_v0  ;;  %2359 = vmatprep.subr.bf16.mxu0 %v3574_v0  ;;  %v40_v1 = vld [vmem:[%s3570_s1] sm:$0xff]  ;;  %v41_v2 = vld [vmem:[%s3570_s1 + $0x8] sm:$0xff]  ;;  %v2664_v3 = vld [vmem:[%s3570_s1 + $0x10] sm:$0xff]  ;;  %vm1639_vm2 = vcmask 7168  }
   0x2   :  { %v123_v4 = vand.u32 4294901760, %v40_v1  ;;  %v126_v5 = vand.u32 4294901760, %v41_v2  ;;  %v2669_v6 = vld [vmem:[%s3570_s1 + $0x18] sm:$0xff]  ;;  %v129_v7 = vand.u32 4294901760, %v2664_v3  ;;  %1851 = vmatprep.mubr.msk.f32.mxu1 %vm2631_vm1, %v2632_v8  ;;  %2100 = vmatprep.mubr.msk.f32.mxu0 %vm2631_vm1, %v2632_v8  ;;  %v15_v9 = vld [vmem:[%s3571_s0] sm:$0xff]  ;;  %v16_v10 = vld [vmem:[%s3571_s0 + $0x8] sm:$0xff] }
   0x3   :  { %v132_v11 = vand.u32 4294901760, %v2669_v6  ;;  %v48_v12 = vsel %vm46_vm0, %v15_v9, 0  ;;  %v51_v13 = vsel %vm46_vm0, %v16_v10, 0  ;;  %v17_v14 = vld [vmem:[%s3571_s0 + $0x10] sm:$0xff]  ;;  %v18_v15 = vld [vmem:[%s3571_s0 + $0x18] sm:$0xff]  ;;  %v19_v22 = vld [vmem:[%s3571_s0 + $0x20] sm:$0xff] }
   0x4   :  { %v2691_v16 = vpack.c.bf16 %v126_v5, %v123_v4  ;;  %v2693_v17 = vsub.f32 %v40_v1, %v123_v4  ;;  %v2695_v18 = vsub.f32 %v41_v2, %v126_v5  ;;  %v2703_v20 = vand.u32 4294901760, %v48_v12  ;;  %v20_v38 = vld [vmem:[%s3571_s0 + $0x28] sm:$0xff]  ;;  %v21_v49 = vld [vmem:[%s3571_s0 + $0x30] sm:$0xff]  ;;  %v22_v56 = vld [vmem:[%s3571_s0 + $0x38] sm:$0xff] }
   0x5   :  { %v2701_v19 = vpack.c.bf16 %v132_v11, %v129_v7  ;;  %v2705_v21 = vand.u32 4294901760, %v51_v13  ;;  %v54_v25 = vsel %vm46_vm0, %v17_v14, 0  ;;  %v57_v26 = vsel %vm46_vm0, %v18_v15, 0  ;;  %v23_v2 = vld [vmem:[%s3571_s0 + $0x40] sm:$0xff] }
   0x6   :  { %2343 = vmatpush3.bf16.msra.mxu1 %v2691_v16  ;;  %2361 = vmatpush3.bf16.msra.mxu0 %v2691_v16  ;;  %v444_v23 = vand.u32 4294901760, %v2693_v17  ;;  %v451_v24 = vand.u32 4294901760, %v2695_v18  ;;  %v2719_v27 = vsub.f32 %v48_v12, %v2703_v20  ;;  %v2724_v29 = vand.u32 4294901760, %v54_v25 }
   0x7   :  { %2344 = vmatprep.subr.bf16.mxu1 %v3574_v0  ;;  %2362 = vmatprep.subr.bf16.mxu0 %v3574_v0  ;;  %v2722_v28 = vsub.f32 %v51_v13, %v2705_v21  ;;  %v2726_v30 = vand.u32 4294901760, %v57_v26  ;;  %v60_v33 = vsel %vm46_vm0, %v19_v22, 0  ;;  %v63_v47 = vsel %vm46_vm0, %v20_v38, 0  ;;  %v24_v13 = vld [vmem:[%s3571_s0 + $0x48] sm:$0xff]  ;;  %v33_v38 = vld [vmem:[%s3571_s0 + $0x90] sm:$0xff] }
   0x8   :  { %v445_v31 = vsub.f32 %v2693_v17, %v444_v23  ;;  %v452_v32 = vsub.f32 %v2695_v18, %v451_v24  ;;  %v193_v34 = vand.u32 4294901760, %v2719_v27  ;;  %v2366_v35 = vpack.c.bf16 %v451_v24, %v444_v23  ;;  %v31_v24 = vld [vmem:[%s3571_s0 + $0x80] sm:$0xff] }
   0x9   :  { %v203_v36 = vand.u32 4294901760, %v2722_v28  ;;  %v2734_v37 = vsub.f32 %v54_v25, %v2724_v29  ;;  %v2742_v41 = vsub.f32 %v57_v26, %v2726_v30  ;;  %v2744_v42 = vand.u32 4294901760, %v60_v33  ;;  %v32_v25 = vld [vmem:[%s3571_s0 + $0x88] sm:$0xff] }
   0xa   :  { %2346 = vmatpush3.bf16.msra.mxu1 %v2701_v19  ;;  %2364 = vmatpush3.bf16.msra.mxu0 %v2701_v19  ;;  %v446_v39 = vand.u32 4294901760, %v445_v31  ;;  %v453_v40 = vand.u32 4294901760, %v452_v32  ;;  %v194_v43 = vsub.f32 %v2719_v27, %v193_v34  ;;  %v2762_v54 = vand.u32 4294901760, %v63_v47 }
   0xb   :  { %2347 = vmatprep.subr.bf16.mxu1 %v3574_v0  ;;  %2365 = vmatprep.subr.bf16.mxu0 %v3574_v0  ;;  %v204_v44 = vsub.f32 %v2722_v28, %v203_v36  ;;  %v213_v45 = vand.u32 4294901760, %v2734_v37  ;;  %v223_v50 = vand.u32 4294901760, %v2742_v41  ;;  %v2759_v51 = vsub.f32 %v60_v33, %v2744_v42  ;;  %v25_v33 = vld [vmem:[%s3571_s0 + $0x50] sm:$0xff] }
   0xc   :  { %v2348_v46 = vpack.c.bf16 %v453_v40, %v446_v39  ;;  %v195_v48 = vand.u32 4294901760, %v194_v43  ;;  %v66_v55 = vsel %vm46_vm0, %v21_v49, 0  ;;  %v2775_v57 = vsub.f32 %v2664_v3, %v129_v7  ;;  %v34_v43 = vld [vmem:[%s3571_s0 + $0x98] sm:$0xff] }
   0xd   :  { %2101 = vmatmul.mubr.f32.vlgmr.msra.gmra.mrb[0].mxu0 %v193_v34  ;;  %v205_v52 = vand.u32 4294901760, %v204_v44  ;;  %v214_v53 = vsub.f32 %v2734_v37, %v213_v45  ;;  %v224_v58 = vsub.f32 %v2742_v41, %v223_v50  ;;  %v233_v59 = vand.u32 4294901760, %v2759_v51 }
   0xe   :  { %2103 = vmatprep.mubr.msk.f32.mxu0 %vm2631_vm1, %v2632_v8  ;;  %2367 = vmatpush3.bf16.msra.mxu0 %v2366_v35  ;;  %v2782_v61 = vsub.f32 %v63_v47, %v2762_v54  ;;  %v2784_v62 = vand.u32 4294901760, %v66_v55  ;;  %v69_v63 = vsel %vm46_vm0, %v22_v56, 0  ;;  %v2790_v1 = vsub.f32 %v2669_v6, %v132_v11 }
   0xf   :  { %1852 = vmatmul.mubr.f32.vlgmr.msra.gmra.mrb[0].mxu1 %v195_v48  ;;  %2368 = vmatprep.subr.bf16.mxu0 %v3574_v0  ;;  %v215_v60 = vand.u32 4294901760, %v214_v53  ;;  %v225_v3 = vand.u32 4294901760, %v224_v58  ;;  %v2799_v4 = vand.u32 4294901760, %v69_v63  ;;  %v458_v5 = vand.u32 4294901760, %v2775_v57  ;;  %v36_v58 = vld [vmem:[%s3571_s0 + $0xa8] sm:$0xff] }
  0x10   :  { %2349 = vmatpush3.bf16.msra.mxu1 %v2348_v46  ;;  %1854 = vmatprep.mubr.msk.f32.mxu1 %vm2631_vm1, %v2632_v8  ;;  %v234_v6 = vsub.f32 %v2759_v51, %v233_v59  ;;  %v243_v7 = vand.u32 4294901760, %v2782_v61  ;;  %v2805_v9 = vsub.f32 %v66_v55, %v2784_v62  ;;  %v72_v10 = vsel %vm46_vm0, %v23_v2, 0  ;;  %v35_v55 = vld [vmem:[%s3571_s0 + $0xa0] sm:$0xff] }
  0x11   :  { %2104 = vmatmul.mubr.f32.gmra.mrb[2].mxu0 %v203_v36  ;;  %2350 = vmatprep.subr.bf16.mxu1 %v3574_v0  ;;  %v459_v11 = vsub.f32 %v2775_v57, %v458_v5  ;;  %v465_v12 = vand.u32 4294901760, %v2790_v1  ;;  %v2818_v14 = vsub.f32 %v69_v63, %v2799_v4  ;;  %v2820_v15 = vand.u32 4294901760, %v72_v10 }
  0x12   :  { %2106 = vmatprep.mubr.msk.f32.mxu0 %vm2631_vm1, %v2632_v8  ;;  %v235_v26 = vand.u32 4294901760, %v234_v6  ;;  %v244_v31 = vsub.f32 %v2782_v61, %v243_v7  ;;  %v253_v32 = vand.u32 4294901760, %v2805_v9  ;;  %v75_v35 = vsel %vm46_vm0, %v24_v13, 0 }
  0x13   :  { %1855 = vmatmul.mubr.f32.gmra.mrb[2].mxu1 %v205_v52  ;;  %v460_v22 = vand.u32 4294901760, %v459_v11  ;;  %v466_v23 = vsub.f32 %v2790_v1, %v465_v12  ;;  %v2369_v34 = vpack.c.bf16 %v465_v12, %v458_v5  ;;  %v2841_v39 = vsel %vm46_vm0, %v31_v24, 0  ;;  %v26_v52 = vld [vmem:[%s3571_s0 + $0x58] sm:$0xff]  ;;  %v37_v11 = vld [vmem:[%s3571_s0 + $0xb0] sm:$0xff]  ;;  %v39_v24 = vld [vmem:[%s3571_s0 + $0xc0] sm:$0xff] }
  0x14   :  { %1857 = vmatprep.mubr.msk.f32.mxu1 %vm2631_vm1, %v2632_v8  ;;  %v2844_v40 = vsel %vm46_vm0, %v32_v25, 0  ;;  %v263_v44 = vand.u32 4294901760, %v2818_v14  ;;  %v78_v46 = vsel %vm46_vm0, %v25_v33, 0  ;;  %v245_v48 = vand.u32 4294901760, %v244_v31  ;;  %v28_v33 = vld [vmem:[%s3571_s0 + $0x68] sm:$0xff] }
  0x15   :  { %2107 = vmatmul.mubr.f32.gmra.mrb[4].mxu0 %v213_v45  ;;  %v467_v36 = vand.u32 4294901760, %v466_v23  ;;  %v2853_v45 = vsub.f32 %v72_v10, %v2820_v15  ;;  %v254_v49 = vsub.f32 %v2805_v9, %v253_v32  ;;  %v2863_v53 = vsel %vm46_vm0, %v33_v38, 0  ;;  %v38_v23 = vld [vmem:[%s3571_s0 + $0xb8] sm:$0xff] }
  0x16   :  { %2109 = vmatprep.mubr.msk.f32.mxu0 %vm2631_vm1, %v2632_v8  ;;  %2370 = vmatpush3.bf16.msra.mxu0 %v2369_v34  ;;  %v2872_v56 = vsel %vm46_vm0, %v34_v43, 0  ;;  %v2884_v63 = vsel %vm46_vm0, %v35_v55, 0  ;;  %v2897_v10 = vsel %vm46_vm0, %v36_v58, 0  ;;  %v2927_v34 = vsel %vm46_vm0, %v38_v23, 0 }
  0x17   :  { %1858 = vmatmul.mubr.f32.gmra.mrb[4].mxu1 %v215_v60  ;;  %v2351_v47 = vpack.c.bf16 %v467_v36, %v460_v22  ;;  %2371 = vmatprep.subr.bf16.mxu0 %v3574_v0  ;;  %v81_v60 = vsel %vm46_vm0, %v26_v52, 0  ;;  %v255_v2 = vand.u32 4294901760, %v254_v49  ;;  %v273_v5 = vand.u32 4294901760, %v2853_v45  ;;  %v29_v52 = vld [vmem:[%s3571_s0 + $0x70] sm:$0xff] }
  0x18   :  { %1860 = vmatprep.mubr.msk.f32.mxu1 %vm2631_vm1, %v2632_v8  ;;  %v2907_v13 = vand.u32 4294901760, %v81_v60  ;;  %v87_v49 = vsel %vm46_vm0, %v28_v33, 0  ;;  %v3062_v36 = vand.u32 4294901760, %v2897_v10 }
  0x19   :  { %2110 = vmatmul.mubr.f32.gmra.mrb[6].mxu0 %v223_v50  ;;  %v2857_v50 = vand.u32 4294901760, %v75_v35  ;;  %2352 = vmatpush3.bf16.msra.mxu1 %v2351_v47 }
  0x1a   :  { %2112 = vmatprep.mubr.msk.f32.mxu0 %vm2631_vm1, %v2632_v8  ;;  %2353 = vmatprep.subr.bf16.mxu1 %v3574_v0  ;;  %v2937_v38 = vsub.f32 %v81_v60, %v2907_v13 }
  0x1b   :  { %1861 = vmatmul.mubr.f32.gmra.mrb[6].mxu1 %v225_v3  ;;  %v264_v3 = vsub.f32 %v2818_v14, %v263_v44  ;;  %v2889_v6 = vsub.f32 %v75_v35, %v2857_v50  ;;  %v2930_v35 = vsel %vm46_vm0, %v39_v24, 0 }
  0x1c   :  { %1863 = vmatprep.mubr.msk.f32.mxu1 %vm2631_vm1, %v2632_v8 }
  0x1d   :  { %2113 = vmatmul.mubr.f32.gmra.mrb[8].mxu0 %v233_v59  ;;  %v2880_v59 = vand.u32 4294901760, %v78_v46  ;;  %v265_v25 = vand.u32 4294901760, %v264_v3  ;;  %v283_v31 = vand.u32 4294901760, %v2889_v6  ;;  %v2958_v3 = vand.u32 4294901760, %v87_v49 }
  0x1e   :  { %2115 = vmatprep.mubr.msk.f32.mxu0 %vm2631_vm1, %v2632_v8 }
  0x1f   :  { %1864 = vmatmul.mubr.f32.gmra.mrb[8].mxu1 %v235_v26  ;;  %v2905_v12 = vsub.f32 %v78_v46, %v2880_v59  ;;  %v274_v26 = vsub.f32 %v2853_v45, %v273_v5  ;;  %v284_v46 = vsub.f32 %v2889_v6, %v283_v31  ;;  %v2971_v24 = vsub.f32 %v87_v49, %v2958_v3 }
  0x20   :  { %1866 = vmatprep.mubr.msk.f32.mxu1 %vm2631_vm1, %v2632_v8 }
  0x21   :  { %2116 = vmatmul.mubr.f32.gmra.mrb[10].mxu0 %v243_v7  ;;  %v27_v7 = vld [vmem:[%s3571_s0 + $0x60] sm:$0xff]  ;;  %v293_v47 = vand.u32 4294901760, %v2905_v12  ;;  %v285_v58 = vand.u32 4294901760, %v284_v46 }
  0x22   :  { %2118 = vmatprep.mubr.msk.f32.mxu0 %vm2631_vm1, %v2632_v8  ;;  %v84_v22 = vsel %vm46_vm0, %v27_v7, 0  ;;  %v30_v7 = vld [vmem:[%s3571_s0 + $0x78] sm:$0xff] }
  0x23   :  { %1867 = vmatmul.mubr.f32.gmra.mrb[10].mxu1 %v245_v48  ;;  %v2939_v43 = vand.u32 4294901760, %v84_v22  ;;  %v294_v60 = vsub.f32 %v2905_v12, %v293_v47 }
  0x24   :  { %1869 = vmatprep.mubr.msk.f32.mxu1 %vm2631_vm1, %v2632_v8 }
  0x25   :  { %2119 = vmatmul.mubr.f32.gmra.mrb[12].mxu0 %v253_v32  ;;  %v2919_v32 = vsel %vm46_vm0, %v37_v11, 0  ;;  %v2954_v55 = vsub.f32 %v84_v22, %v2939_v43  ;;  %v295_v22 = vand.u32 4294901760, %v294_v60 }
  0x26   :  { %2121 = vmatprep.mubr.msk.f32.mxu0 %vm2631_vm1, %v2632_v8  ;;  %v3075_v0 = vand.u32 4294901760, %v2919_v32 }
  0x27   :  { %1870 = vmatmul.mubr.f32.gmra.mrb[12].mxu1 %v255_v2  ;;  %v303_v2 = vand.u32 4294901760, %v2937_v38  ;;  %v313_v11 = vand.u32 4294901760, %v2954_v55 }
  0x28   :  { %1872 = vmatprep.mubr.msk.f32.mxu1 %vm2631_vm1, %v2632_v8 }
  0x29   :  { %2122 = vmatmul.mubr.f32.gmra.mrb[14].mxu0 %v263_v44  ;;  %v275_v44 = vand.u32 4294901760, %v274_v26  ;;  %v304_v23 = vsub.f32 %v2937_v38, %v303_v2  ;;  %v93_v26 = vsel %vm46_vm0, %v30_v7, 0 }
  0x2a   :  { %2124 = vmatprep.mubr.msk.f32.mxu0 %vm2631_vm1, %v2632_v8  ;;  %v2985_v49 = vand.u32 4294901760, %v93_v26 }
  0x2b   :  { %1873 = vmatmul.mubr.f32.gmra.mrb[14].mxu1 %v265_v25  ;;  %v305_v33 = vand.u32 4294901760, %v304_v23 }
  0x2c   :  { %1875 = vmatprep.mubr.msk.f32.mxu1 %vm2631_vm1, %v2632_v8  ;;  %v2994_v60 = vsub.f32 %v93_v26, %v2985_v49 }
  0x2d   :  { %2125 = vmatmul.mubr.f32.gmra.mrb[16].mxu0 %v273_v5  ;;  %v90_v5 = vsel %vm46_vm0, %v29_v52, 0 }
  0x2e   :  { %2127 = vmatprep.mubr.msk.f32.mxu0 %vm2631_vm1, %v2632_v8  ;;  %v2973_v25 = vand.u32 4294901760, %v90_v5  ;;  %v343_v23 = vand.u32 4294901760, %v2994_v60 }
  0x2f   :  { %1876 = vmatmul.mubr.f32.gmra.mrb[16].mxu1 %v275_v44  ;;  %v323_v44 = vand.u32 4294901760, %v2971_v24 }
  0x30   :  { %1878 = vmatprep.mubr.msk.f32.mxu1 %vm2631_vm1, %v2632_v8  ;;  %v2983_v46 = vsub.f32 %v90_v5, %v2973_v25  ;;  %v2997_v5 = vand.u32 4294901760, %v2841_v39 }
  0x31   :  { %2128 = vmatmul.mubr.f32.gmra.mrb[18].mxu0 %v283_v31  ;;  %v314_v31 = vsub.f32 %v2954_v55, %v313_v11  ;;  %v324_v52 = vsub.f32 %v2971_v24, %v323_v44 }
  0x32   :  { %2130 = vmatprep.mubr.msk.f32.mxu0 %vm2631_vm1, %v2632_v8  ;;  %v3010_v26 = vsub.f32 %v2841_v39, %v2997_v5 }
  0x33   :  { %1879 = vmatmul.mubr.f32.gmra.mrb[18].mxu1 %v285_v58  ;;  %v333_v58 = vand.u32 4294901760, %v2983_v46  ;;  %v325_v7 = vand.u32 4294901760, %v324_v52 }
  0x34   :  { %1881 = vmatprep.mubr.msk.f32.mxu1 %vm2631_vm1, %v2632_v8 }
  0x35   :  { %2131 = vmatmul.mubr.f32.gmra.mrb[20].mxu0 %v293_v47  ;;  %v315_v47 = vand.u32 4294901760, %v314_v31 }
  0x36   :  { %2133 = vmatprep.mubr.msk.f32.mxu0 %vm2631_vm1, %v2632_v8 }
  0x37   :  { %1882 = vmatmul.mubr.f32.gmra.mrb[20].mxu1 %v295_v22  ;;  %v334_v22 = vsub.f32 %v2983_v46, %v333_v58 }
  0x38   :  { %1884 = vmatprep.mubr.msk.f32.mxu1 %vm2631_vm1, %v2632_v8 }
  0x39   :  { %2134 = vmatmul.mubr.f32.gmra.mrb[22].mxu0 %v303_v2  ;;  %v3004_v2 = vand.u32 4294901760, %v2844_v40  ;;  %v335_v31 = vand.u32 4294901760, %v334_v22 }
  0x3a   :  { %2136 = vmatprep.mubr.msk.f32.mxu0 %vm2631_vm1, %v2632_v8 }
  0x3b   :  { %1885 = vmatmul.mubr.f32.gmra.mrb[22].mxu1 %v305_v33  ;;  %v344_v33 = vsub.f32 %v2994_v60, %v343_v23  ;;  %v3023_v39 = vsub.f32 %v2844_v40, %v3004_v2 }
  0x3c   :  { %1887 = vmatprep.mubr.msk.f32.mxu1 %vm2631_vm1, %v2632_v8 }
  0x3d   :  { %2137 = vmatmul.mubr.f32.gmra.mrb[24].mxu0 %v313_v11  ;;  %v3017_v11 = vand.u32 4294901760, %v2863_v53  ;;  %v345_v52 = vand.u32 4294901760, %v344_v33  ;;  %v363_v22 = vand.u32 4294901760, %v3023_v39 }
  0x3e   :  { %2139 = vmatprep.mubr.msk.f32.mxu0 %vm2631_vm1, %v2632_v8 }
  0x3f   :  { %1888 = vmatmul.mubr.f32.gmra.mrb[24].mxu1 %v315_v47  ;;  %v353_v47 = vand.u32 4294901760, %v3010_v26  ;;  %v3036_v40 = vsub.f32 %v2863_v53, %v3017_v11  ;;  %v364_v33 = vsub.f32 %v3023_v39, %v363_v22  ;;  %v3049_v53 = vand.u32 4294901760, %v2884_v63 }
  0x40   :  { %1890 = vmatprep.mubr.msk.f32.mxu1 %vm2631_vm1, %v2632_v8 }
  0x41   :  { %2140 = vmatmul.mubr.f32.gmra.mrb[26].mxu0 %v323_v44  ;;  %v3030_v44 = vand.u32 4294901760, %v2872_v56  ;;  %v373_v48 = vand.u32 4294901760, %v3036_v40 }
  0x42   :  { %2142 = vmatprep.mubr.msk.f32.mxu0 %vm2631_vm1, %v2632_v8 }
  0x43   :  { %1891 = vmatmul.mubr.f32.gmra.mrb[26].mxu1 %v325_v7  ;;  %v354_v7 = vsub.f32 %v3010_v26, %v353_v47 }
  0x44   :  { %1893 = vmatprep.mubr.msk.f32.mxu1 %vm2631_vm1, %v2632_v8 }
  0x45   :  { %2143 = vmatmul.mubr.f32.gmra.mrb[28].mxu0 %v333_v58  ;;  %v3044_v58 = vsub.f32 %v2872_v56, %v3030_v44  ;;  %v365_v56 = vand.u32 4294901760, %v364_v33 }
  0x46   :  { %2145 = vmatprep.mubr.msk.f32.mxu0 %vm2631_vm1, %v2632_v8 }
  0x47   :  { %1894 = vmatmul.mubr.f32.gmra.mrb[28].mxu1 %v335_v31  ;;  %3579 = vst [vmem:[#allocation3_spill] sm:$0xff] %v3044_v58  ;;  %v355_v31 = vand.u32 4294901760, %v354_v7  ;;  %v3059_v7 = vsub.f32 %v2884_v63, %v3049_v53  ;;  %v3072_v63 = vsub.f32 %v2897_v10, %v3062_v36  ;;  %v3085_v10 = vsub.f32 %v2919_v32, %v3075_v0 }
  0x48   :  { %1896 = vmatprep.mubr.msk.f32.mxu1 %vm2631_vm1, %v2632_v8 }
  0x49   :  { %2146 = vmatmul.mubr.f32.gmra.mrb[30].mxu0 %v343_v23  ;;  %v383_v23 = vand.u32 4294901760, %v3044_v58  ;;  %3580 = vst [vmem:[#allocation4_spill] sm:$0xff] %v3059_v7  ;;  %v393_v33 = vand.u32 4294901760, %v3059_v7  ;;  %3581 = vst [vmem:[#allocation5_spill] sm:$0xff] %v3072_v63  ;;  %v413_v32 = vand.u32 4294901760, %v3085_v10 }
  0x4a   :  { %2148 = vmatprep.mubr.msk.f32.mxu0 %vm2631_vm1, %v2632_v8 }
  0x4b   :  { %1897 = vmatmul.mubr.f32.gmra.mrb[30].mxu1 %v345_v52  ;;  %v374_v52 = vsub.f32 %v3036_v40, %v373_v48 }
  0x4c   :  { %1899 = vmatprep.mubr.msk.f32.mxu1 %vm2631_vm1, %v2632_v8 }
  0x4d   :  { %2149 = vmatmul.mubr.f32.gmra.mrb[32].mxu0 %v353_v47  ;;  %v384_v47 = vsub.f32 %v3044_v58, %v383_v23  ;;  %v3088_v58 = vand.u32 4294901760, %v2927_v34 }
  0x4e   :  { %2151 = vmatprep.mubr.msk.f32.mxu0 %vm2631_vm1, %v2632_v8 }
  0x4f   :  { %1900 = vmatmul.mubr.f32.gmra.mrb[32].mxu1 %v355_v31  ;;  %v375_v31 = vand.u32 4294901760, %v374_v52  ;;  %v403_v52 = vand.u32 4294901760, %v3072_v63 }
  0x50   :  { %1902 = vmatprep.mubr.msk.f32.mxu1 %vm2631_vm1, %v2632_v8 }
  0x51   :  { %2152 = vmatmul.mubr.f32.gmra.mrb[34].mxu0 %v363_v22  ;;  %v385_v22 = vand.u32 4294901760, %v384_v47 }
  0x52   :  { %2154 = vmatprep.mubr.msk.f32.mxu0 %vm2631_vm1, %v2632_v8 }
  0x53   :  { %1903 = vmatmul.mubr.f32.gmra.mrb[34].mxu1 %v365_v56  ;;  %v394_v56 = vsub.f32 %v3059_v7, %v393_v33  ;;  %v3101_v7 = vsub.f32 %v2927_v34, %v3088_v58 }
  0x54   :  { %1905 = vmatprep.mubr.msk.f32.mxu1 %vm2631_vm1, %v2632_v8 }
  0x55   :  { %2155 = vmatmul.mubr.f32.gmra.mrb[36].mxu0 %v373_v48  ;;  %v3095_v48 = vand.u32 4294901760, %v2930_v35  ;;  %v395_v47 = vand.u32 4294901760, %v394_v56  ;;  %v423_v56 = vand.u32 4294901760, %v3101_v7 }
  0x56   :  { %2157 = vmatprep.mubr.msk.f32.mxu0 %vm2631_vm1, %v2632_v8 }
  0x57   :  { %1906 = vmatmul.mubr.f32.gmra.mrb[36].mxu1 %v375_v31  ;;  %v404_v31 = vsub.f32 %v3072_v63, %v403_v52  ;;  %v3111_v63 = vsub.f32 %v2930_v35, %v3095_v48 }
  0x58   :  { %1908 = vmatprep.mubr.msk.f32.mxu1 %vm2631_vm1, %v2632_v8 }
  0x59   :  { %2158 = vmatmul.mubr.f32.gmra.mrb[38].mxu0 %v383_v23  ;;  %v405_v23 = vand.u32 4294901760, %v404_v31 }
  0x5a   :  { %2160 = vmatprep.mubr.msk.f32.mxu0 %vm2631_vm1, %v2632_v8 }
  0x5b   :  { %1909 = vmatmul.mubr.f32.gmra.mrb[38].mxu1 %v385_v22  ;;  %v414_v22 = vsub.f32 %v3085_v10, %v413_v32 }
  0x5c   :  { %1911 = vmatprep.mubr.msk.f32.mxu1 %vm2631_vm1, %v2632_v8 }
  0x5d   :  { %2161 = vmatmul.mubr.f32.gmra.mrb[40].mxu0 %v393_v33  ;;  %v415_v34 = vand.u32 4294901760, %v414_v22  ;;  %v424_v33 = vsub.f32 %v3101_v7, %v423_v56 }
  0x5e   :  { %2163 = vmatprep.mubr.msk.f32.mxu0 %vm2631_vm1, %v2632_v8 }
  0x5f   :  { %1912 = vmatmul.mubr.f32.gmra.mrb[40].mxu1 %v395_v47  ;;  %v433_v47 = vand.u32 4294901760, %v3111_v63  ;;  %v425_v35 = vand.u32 4294901760, %v424_v33 }
  0x60   :  { %1914 = vmatprep.mubr.msk.f32.mxu1 %vm2631_vm1, %v2632_v8 }
  0x61   :  { %2164 = vmatmul.mubr.f32.gmra.mrb[42].mxu0 %v403_v52  ;;  %v434_v52 = vsub.f32 %v3111_v63, %v433_v47 }
  0x62   :  { %2166 = vmatprep.mubr.msk.f32.mxu0 %vm2631_vm1, %v2632_v8 }
  0x63   :  { %1915 = vmatmul.mubr.f32.gmra.mrb[42].mxu1 %v405_v23  ;;  %v435_v31 = vand.u32 4294901760, %v434_v52  ;;  %v3583_v23 = vpack.c.bf16 %v2695_v18, %v2693_v17  ;;  %v3585_v17 = vld [vmem:[#allocation3_spill] sm:$0xff]  ;;  %v3586_v18 = vld [vmem:[#allocation4_spill] sm:$0xff] }
  0x64   :  { %1917 = vmatprep.mubr.msk.f32.mxu1 %vm2631_vm1, %v2632_v8 }
  0x65   :  { %2167 = vmatmul.mubr.f32.gmra.mrb[44].mxu0 %v413_v32  ;;  %v3582_v32 = vmov 0.0|0.0  }
  0x66   :  { %2169 = vmatprep.mubr.msk.f32.mxu0 %vm2631_vm1, %v2632_v8 }
  0x67   :  { %1918 = vmatmul.mubr.f32.gmra.mrb[44].mxu1 %v415_v34 }
  0x68   :  { %1920 = vmatprep.mubr.msk.f32.mxu1 %vm2631_vm1, %v2632_v8 }
  0x69   :  { %2170 = vmatmul.mubr.f32.gmra.mrb[46].mxu0 %v423_v56 }
  0x6a   :  { %2172 = vmatprep.mubr.msk.f32.mxu0 %vm2631_vm1, %v2632_v8 }
  0x6b   :  { %1921 = vmatmul.mubr.f32.gmra.mrb[46].mxu1 %v425_v35 }
  0x6c   :  { %1923 = vmatprep.mubr.msk.f32.mxu1 %vm2631_vm1, %v2632_v8 }
  0x6d   :  { %2173 = vmatmul.mubr.f32.gmra.mrb[48].mxu0 %v433_v47 }
  0x6e   :  { %2183 = vmatprep.mubr.msk.f32.mxu0 %vm2631_vm1, %v2632_v8 }
  0x6f   :  { %1924 = vmatmul.mubr.f32.gmra.mrb[48].mxu1 %v435_v31 }
  0x70   :  { %1934 = vmatprep.mubr.msk.f32.mxu1 %vm2631_vm1, %v2632_v8 }
  0x71   :  { %2184 = vmatmul.mubr.f32.vlgmr.msra.gmra.mrb[0].mxu0 %v2703_v20 }
  0x72   :  { %2186 = vmatprep.mubr.msk.f32.mxu0 %vm2631_vm1, %v2632_v8  ;;  %2373 = vmatpush3.bf16.msra.mxu0 %v2691_v16  ;;  %v3584_v16 = vpack.c.bf16 %v2790_v1, %v2775_v57 }
  0x73   :  { %1935 = vmatmul.mubr.f32.vlgmr.msra.gmra.mrb[0].mxu1 %v2703_v20  ;;  %2374 = vmatprep.subr.bf16.mxu0 %v3582_v32 }
  0x74   :  { %2355 = vmatpush3.bf16.msra.mxu1 %v3583_v23  ;;  %1937 = vmatprep.mubr.msk.f32.mxu1 %vm2631_vm1, %v2632_v8 }
  0x75   :  { %2187 = vmatmul.mubr.f32.gmra.mrb[2].mxu0 %v2705_v21  ;;  %2356 = vmatprep.subr.bf16.mxu1 %v3582_v32 }
  0x76   :  { %2189 = vmatprep.mubr.msk.f32.mxu0 %vm2631_vm1, %v2632_v8  ;;  %2376 = vmatpush3.bf16.msra.mxu0 %v2701_v19  ;;  %v3587_v19 = vld [vmem:[#allocation5_spill] sm:$0xff] }
  0x77   :  { %1938 = vmatmul.mubr.f32.gmra.mrb[2].mxu1 %v2705_v21 }
  0x78   :  { %1940 = vmatprep.mubr.msk.f32.mxu1 %vm2631_vm1, %v2632_v8  ;;  %2358 = vmatpush3.bf16.msra.mxu1 %v3584_v16 }
  0x79   :  { %2190 = vmatmul.mubr.f32.gmra.mrb[4].mxu0 %v2724_v29 }
  0x7a   :  { %2192 = vmatprep.mubr.msk.f32.mxu0 %vm2631_vm1, %v2632_v8 }
  0x7b   :  { %1941 = vmatmul.mubr.f32.gmra.mrb[4].mxu1 %v2724_v29 }
  0x7c   :  { %1943 = vmatprep.mubr.msk.f32.mxu1 %vm2631_vm1, %v2632_v8 }
  0x7d   :  { %2193 = vmatmul.mubr.f32.gmra.mrb[6].mxu0 %v2726_v30 }
  0x7e   :  { %2195 = vmatprep.mubr.msk.f32.mxu0 %vm2631_vm1, %v2632_v8 }
  0x7f   :  { %1944 = vmatmul.mubr.f32.gmra.mrb[6].mxu1 %v2726_v30 }
  0x80   :  { %1946 = vmatprep.mubr.msk.f32.mxu1 %vm2631_vm1, %v2632_v8 }
  0x81   :  { %2196 = vmatmul.mubr.f32.gmra.mrb[8].mxu0 %v2744_v42 }
  0x82   :  { %2198 = vmatprep.mubr.msk.f32.mxu0 %vm2631_vm1, %v2632_v8 }
  0x83   :  { %1947 = vmatmul.mubr.f32.gmra.mrb[8].mxu1 %v2744_v42 }
  0x84   :  { %1949 = vmatprep.mubr.msk.f32.mxu1 %vm2631_vm1, %v2632_v8 }
  0x85   :  { %2199 = vmatmul.mubr.f32.gmra.mrb[10].mxu0 %v2762_v54 }
  0x86   :  { %2201 = vmatprep.mubr.msk.f32.mxu0 %vm2631_vm1, %v2632_v8 }
  0x87   :  { %1950 = vmatmul.mubr.f32.gmra.mrb[10].mxu1 %v2762_v54 }
  0x88   :  { %1952 = vmatprep.mubr.msk.f32.mxu1 %vm2631_vm1, %v2632_v8 }
  0x89   :  { %2202 = vmatmul.mubr.f32.gmra.mrb[12].mxu0 %v2784_v62 }
  0x8a   :  { %2204 = vmatprep.mubr.msk.f32.mxu0 %vm2631_vm1, %v2632_v8 }
  0x8b   :  { %1953 = vmatmul.mubr.f32.gmra.mrb[12].mxu1 %v2784_v62 }
  0x8c   :  { %1955 = vmatprep.mubr.msk.f32.mxu1 %vm2631_vm1, %v2632_v8 }
  0x8d   :  { %2205 = vmatmul.mubr.f32.gmra.mrb[14].mxu0 %v2799_v4 }
  0x8e   :  { %2207 = vmatprep.mubr.msk.f32.mxu0 %vm2631_vm1, %v2632_v8 }
  0x8f   :  { %1956 = vmatmul.mubr.f32.gmra.mrb[14].mxu1 %v2799_v4 }
  0x90   :  { %1958 = vmatprep.mubr.msk.f32.mxu1 %vm2631_vm1, %v2632_v8 }
  0x91   :  { %2208 = vmatmul.mubr.f32.gmra.mrb[16].mxu0 %v2820_v15 }
  0x92   :  { %2210 = vmatprep.mubr.msk.f32.mxu0 %vm2631_vm1, %v2632_v8 }
  0x93   :  { %1959 = vmatmul.mubr.f32.gmra.mrb[16].mxu1 %v2820_v15 }
  0x94   :  { %1961 = vmatprep.mubr.msk.f32.mxu1 %vm2631_vm1, %v2632_v8 }
  0x95   :  { %2211 = vmatmul.mubr.f32.gmra.mrb[18].mxu0 %v2857_v50 }
  0x96   :  { %2213 = vmatprep.mubr.msk.f32.mxu0 %vm2631_vm1, %v2632_v8 }
  0x97   :  { %1962 = vmatmul.mubr.f32.gmra.mrb[18].mxu1 %v2857_v50 }
  0x98   :  { %1964 = vmatprep.mubr.msk.f32.mxu1 %vm2631_vm1, %v2632_v8 }
  0x99   :  { %2214 = vmatmul.mubr.f32.gmra.mrb[20].mxu0 %v2880_v59 }
  0x9a   :  { %2216 = vmatprep.mubr.msk.f32.mxu0 %vm2631_vm1, %v2632_v8 }
  0x9b   :  { %1965 = vmatmul.mubr.f32.gmra.mrb[20].mxu1 %v2880_v59 }
  0x9c   :  { %1967 = vmatprep.mubr.msk.f32.mxu1 %vm2631_vm1, %v2632_v8 }
  0x9d   :  { %2217 = vmatmul.mubr.f32.gmra.mrb[22].mxu0 %v2907_v13 }
  0x9e   :  { %2219 = vmatprep.mubr.msk.f32.mxu0 %vm2631_vm1, %v2632_v8 }
  0x9f   :  { %1968 = vmatmul.mubr.f32.gmra.mrb[22].mxu1 %v2907_v13 }
  0xa0   :  { %1970 = vmatprep.mubr.msk.f32.mxu1 %vm2631_vm1, %v2632_v8 }
  0xa1   :  { %2220 = vmatmul.mubr.f32.gmra.mrb[24].mxu0 %v2939_v43 }
  0xa2   :  { %2222 = vmatprep.mubr.msk.f32.mxu0 %vm2631_vm1, %v2632_v8 }
  0xa3   :  { %1971 = vmatmul.mubr.f32.gmra.mrb[24].mxu1 %v2939_v43 }
  0xa4   :  { %1973 = vmatprep.mubr.msk.f32.mxu1 %vm2631_vm1, %v2632_v8 }
  0xa5   :  { %2223 = vmatmul.mubr.f32.gmra.mrb[26].mxu0 %v2958_v3 }
  0xa6   :  { %2225 = vmatprep.mubr.msk.f32.mxu0 %vm2631_vm1, %v2632_v8 }
  0xa7   :  { %1974 = vmatmul.mubr.f32.gmra.mrb[26].mxu1 %v2958_v3 }
  0xa8   :  { %1976 = vmatprep.mubr.msk.f32.mxu1 %vm2631_vm1, %v2632_v8 }
  0xa9   :  { %2226 = vmatmul.mubr.f32.gmra.mrb[28].mxu0 %v2973_v25 }
  0xaa   :  { %2228 = vmatprep.mubr.msk.f32.mxu0 %vm2631_vm1, %v2632_v8 }
  0xab   :  { %1977 = vmatmul.mubr.f32.gmra.mrb[28].mxu1 %v2973_v25 }
  0xac   :  { %1979 = vmatprep.mubr.msk.f32.mxu1 %vm2631_vm1, %v2632_v8 }
  0xad   :  { %2229 = vmatmul.mubr.f32.gmra.mrb[30].mxu0 %v2985_v49 }
  0xae   :  { %2231 = vmatprep.mubr.msk.f32.mxu0 %vm2631_vm1, %v2632_v8 }
  0xaf   :  { %1980 = vmatmul.mubr.f32.gmra.mrb[30].mxu1 %v2985_v49 }
  0xb0   :  { %1982 = vmatprep.mubr.msk.f32.mxu1 %vm2631_vm1, %v2632_v8 }
  0xb1   :  { %2232 = vmatmul.mubr.f32.gmra.mrb[32].mxu0 %v2997_v5 }
  0xb2   :  { %2234 = vmatprep.mubr.msk.f32.mxu0 %vm2631_vm1, %v2632_v8 }
  0xb3   :  { %1983 = vmatmul.mubr.f32.gmra.mrb[32].mxu1 %v2997_v5 }
  0xb4   :  { %1985 = vmatprep.mubr.msk.f32.mxu1 %vm2631_vm1, %v2632_v8 }
  0xb5   :  { %2235 = vmatmul.mubr.f32.gmra.mrb[34].mxu0 %v3004_v2 }
  0xb6   :  { %2237 = vmatprep.mubr.msk.f32.mxu0 %vm2631_vm1, %v2632_v8 }
  0xb7   :  { %1986 = vmatmul.mubr.f32.gmra.mrb[34].mxu1 %v3004_v2 }
  0xb8   :  { %1988 = vmatprep.mubr.msk.f32.mxu1 %vm2631_vm1, %v2632_v8 }
  0xb9   :  { %2238 = vmatmul.mubr.f32.gmra.mrb[36].mxu0 %v3017_v11 }
  0xba   :  { %2240 = vmatprep.mubr.msk.f32.mxu0 %vm2631_vm1, %v2632_v8 }
  0xbb   :  { %1989 = vmatmul.mubr.f32.gmra.mrb[36].mxu1 %v3017_v11 }
  0xbc   :  { %1991 = vmatprep.mubr.msk.f32.mxu1 %vm2631_vm1, %v2632_v8 }
  0xbd   :  { %2241 = vmatmul.mubr.f32.gmra.mrb[38].mxu0 %v3030_v44 }
  0xbe   :  { %2243 = vmatprep.mubr.msk.f32.mxu0 %vm2631_vm1, %v2632_v8 }
  0xbf   :  { %1992 = vmatmul.mubr.f32.gmra.mrb[38].mxu1 %v3030_v44 }
  0xc0   :  { %1994 = vmatprep.mubr.msk.f32.mxu1 %vm2631_vm1, %v2632_v8 }
  0xc1   :  { %2244 = vmatmul.mubr.f32.gmra.mrb[40].mxu0 %v3049_v53 }
  0xc2   :  { %2246 = vmatprep.mubr.msk.f32.mxu0 %vm2631_vm1, %v2632_v8 }
  0xc3   :  { %1995 = vmatmul.mubr.f32.gmra.mrb[40].mxu1 %v3049_v53 }
  0xc4   :  { %1997 = vmatprep.mubr.msk.f32.mxu1 %vm2631_vm1, %v2632_v8 }
  0xc5   :  { %2247 = vmatmul.mubr.f32.gmra.mrb[42].mxu0 %v3062_v36 }
  0xc6   :  { %2249 = vmatprep.mubr.msk.f32.mxu0 %vm2631_vm1, %v2632_v8 }
  0xc7   :  { %1998 = vmatmul.mubr.f32.gmra.mrb[42].mxu1 %v3062_v36 }
  0xc8   :  { %2000 = vmatprep.mubr.msk.f32.mxu1 %vm2631_vm1, %v2632_v8 }
  0xc9   :  { %2250 = vmatmul.mubr.f32.gmra.mrb[44].mxu0 %v3075_v0 }
  0xca   :  { %2252 = vmatprep.mubr.msk.f32.mxu0 %vm2631_vm1, %v2632_v8 }
  0xcb   :  { %2001 = vmatmul.mubr.f32.gmra.mrb[44].mxu1 %v3075_v0 }
  0xcc   :  { %2003 = vmatprep.mubr.msk.f32.mxu1 %vm2631_vm1, %v2632_v8 }
  0xcd   :  { %2253 = vmatmul.mubr.f32.gmra.mrb[46].mxu0 %v3088_v58 }
  0xce   :  { %2255 = vmatprep.mubr.msk.f32.mxu0 %vm2631_vm1, %v2632_v8 }
  0xcf   :  { %2004 = vmatmul.mubr.f32.gmra.mrb[46].mxu1 %v3088_v58 }
  0xd0   :  { %2006 = vmatprep.mubr.msk.f32.mxu1 %vm2631_vm1, %v2632_v8 }
  0xd1   :  { %2256 = vmatmul.mubr.f32.gmra.mrb[48].mxu0 %v3095_v48 }
  0xd2   :  { %2266 = vmatprep.mubr.msk.f32.mxu0 %vm2631_vm1, %v2632_v8 }
  0xd3   :  { %2007 = vmatmul.mubr.f32.gmra.mrb[48].mxu1 %v3095_v48 }
  0xd4   :  { %2017 = vmatprep.mubr.msk.f32.mxu1 %vm2631_vm1, %v2632_v8 }
  0xd5   :  { %2267 = vmatmul.mubr.f32.vlgmr.msra.gmra.mrb[0].mxu0 %v2703_v20 }
  0xd6   :  { %2269 = vmatprep.mubr.msk.f32.mxu0 %vm2631_vm1, %v2632_v8 }
  0xd7   :  { %2018 = vmatmul.mubr.f32.vlgmr.msra.gmra.mrb[0].mxu1 %v2719_v27 }
  0xd8   :  { %2020 = vmatprep.mubr.msk.f32.mxu1 %vm2631_vm1, %v2632_v8 }
  0xd9   :  { %2270 = vmatmul.mubr.f32.gmra.mrb[2].mxu0 %v2705_v21 }
  0xda   :  { %2272 = vmatprep.mubr.msk.f32.mxu0 %vm2631_vm1, %v2632_v8 }
  0xdb   :  { %2021 = vmatmul.mubr.f32.gmra.mrb[2].mxu1 %v2722_v28 }
  0xdc   :  { %2023 = vmatprep.mubr.msk.f32.mxu1 %vm2631_vm1, %v2632_v8 }
  0xdd   :  { %2273 = vmatmul.mubr.f32.gmra.mrb[4].mxu0 %v2724_v29 }
  0xde   :  { %2275 = vmatprep.mubr.msk.f32.mxu0 %vm2631_vm1, %v2632_v8 }
  0xdf   :  { %2024 = vmatmul.mubr.f32.gmra.mrb[4].mxu1 %v2734_v37 }
  0xe0   :  { %2026 = vmatprep.mubr.msk.f32.mxu1 %vm2631_vm1, %v2632_v8 }
  0xe1   :  { %2276 = vmatmul.mubr.f32.gmra.mrb[6].mxu0 %v2726_v30 }
  0xe2   :  { %2278 = vmatprep.mubr.msk.f32.mxu0 %vm2631_vm1, %v2632_v8 }
  0xe3   :  { %2027 = vmatmul.mubr.f32.gmra.mrb[6].mxu1 %v2742_v41 }
  0xe4   :  { %2029 = vmatprep.mubr.msk.f32.mxu1 %vm2631_vm1, %v2632_v8 }
  0xe5   :  { %2279 = vmatmul.mubr.f32.gmra.mrb[8].mxu0 %v2744_v42 }
  0xe6   :  { %2281 = vmatprep.mubr.msk.f32.mxu0 %vm2631_vm1, %v2632_v8 }
  0xe7   :  { %2030 = vmatmul.mubr.f32.gmra.mrb[8].mxu1 %v2759_v51 }
  0xe8   :  { %2032 = vmatprep.mubr.msk.f32.mxu1 %vm2631_vm1, %v2632_v8 }
  0xe9   :  { %2282 = vmatmul.mubr.f32.gmra.mrb[10].mxu0 %v2762_v54 }
  0xea   :  { %2284 = vmatprep.mubr.msk.f32.mxu0 %vm2631_vm1, %v2632_v8 }
  0xeb   :  { %2033 = vmatmul.mubr.f32.gmra.mrb[10].mxu1 %v2782_v61 }
  0xec   :  { %2035 = vmatprep.mubr.msk.f32.mxu1 %vm2631_vm1, %v2632_v8 }
  0xed   :  { %2285 = vmatmul.mubr.f32.gmra.mrb[12].mxu0 %v2784_v62 }
  0xee   :  { %2287 = vmatprep.mubr.msk.f32.mxu0 %vm2631_vm1, %v2632_v8 }
  0xef   :  { %2036 = vmatmul.mubr.f32.gmra.mrb[12].mxu1 %v2805_v9 }
  0xf0   :  { %2038 = vmatprep.mubr.msk.f32.mxu1 %vm2631_vm1, %v2632_v8 }
  0xf1   :  { %2288 = vmatmul.mubr.f32.gmra.mrb[14].mxu0 %v2799_v4 }
  0xf2   :  { %2290 = vmatprep.mubr.msk.f32.mxu0 %vm2631_vm1, %v2632_v8 }
  0xf3   :  { %2039 = vmatmul.mubr.f32.gmra.mrb[14].mxu1 %v2818_v14 }
  0xf4   :  { %2041 = vmatprep.mubr.msk.f32.mxu1 %vm2631_vm1, %v2632_v8 }
  0xf5   :  { %2291 = vmatmul.mubr.f32.gmra.mrb[16].mxu0 %v2820_v15 }
  0xf6   :  { %2293 = vmatprep.mubr.msk.f32.mxu0 %vm2631_vm1, %v2632_v8 }
  0xf7   :  { %2042 = vmatmul.mubr.f32.gmra.mrb[16].mxu1 %v2853_v45 }
  0xf8   :  { %2044 = vmatprep.mubr.msk.f32.mxu1 %vm2631_vm1, %v2632_v8 }
  0xf9   :  { %2294 = vmatmul.mubr.f32.gmra.mrb[18].mxu0 %v2857_v50 }
  0xfa   :  { %2296 = vmatprep.mubr.msk.f32.mxu0 %vm2631_vm1, %v2632_v8 }
  0xfb   :  { %2045 = vmatmul.mubr.f32.gmra.mrb[18].mxu1 %v2889_v6 }
  0xfc   :  { %2047 = vmatprep.mubr.msk.f32.mxu1 %vm2631_vm1, %v2632_v8 }
  0xfd   :  { %2297 = vmatmul.mubr.f32.gmra.mrb[20].mxu0 %v2880_v59 }
  0xfe   :  { %2299 = vmatprep.mubr.msk.f32.mxu0 %vm2631_vm1, %v2632_v8 }
  0xff   :  { %2048 = vmatmul.mubr.f32.gmra.mrb[20].mxu1 %v2905_v12 }
 0x100   :  { %2050 = vmatprep.mubr.msk.f32.mxu1 %vm2631_vm1, %v2632_v8 }
 0x101   :  { %2300 = vmatmul.mubr.f32.gmra.mrb[22].mxu0 %v2907_v13 }
 0x102   :  { %2302 = vmatprep.mubr.msk.f32.mxu0 %vm2631_vm1, %v2632_v8 }
 0x103   :  { %2051 = vmatmul.mubr.f32.gmra.mrb[22].mxu1 %v2937_v38 }
 0x104   :  { %2053 = vmatprep.mubr.msk.f32.mxu1 %vm2631_vm1, %v2632_v8 }
 0x105   :  { %2303 = vmatmul.mubr.f32.gmra.mrb[24].mxu0 %v2939_v43 }
 0x106   :  { %2305 = vmatprep.mubr.msk.f32.mxu0 %vm2631_vm1, %v2632_v8 }
 0x107   :  { %2054 = vmatmul.mubr.f32.gmra.mrb[24].mxu1 %v2954_v55 }
 0x108   :  { %2056 = vmatprep.mubr.msk.f32.mxu1 %vm2631_vm1, %v2632_v8 }
 0x109   :  { %2306 = vmatmul.mubr.f32.gmra.mrb[26].mxu0 %v2958_v3 }
 0x10a   :  { %2308 = vmatprep.mubr.msk.f32.mxu0 %vm2631_vm1, %v2632_v8 }
 0x10b   :  { %2057 = vmatmul.mubr.f32.gmra.mrb[26].mxu1 %v2971_v24 }
 0x10c   :  { %2059 = vmatprep.mubr.msk.f32.mxu1 %vm2631_vm1, %v2632_v8 }
 0x10d   :  { %2309 = vmatmul.mubr.f32.gmra.mrb[28].mxu0 %v2973_v25 }
 0x10e   :  { %2311 = vmatprep.mubr.msk.f32.mxu0 %vm2631_vm1, %v2632_v8 }
 0x10f   :  { %2060 = vmatmul.mubr.f32.gmra.mrb[28].mxu1 %v2983_v46 }
 0x110   :  { %2062 = vmatprep.mubr.msk.f32.mxu1 %vm2631_vm1, %v2632_v8 }
 0x111   :  { %2312 = vmatmul.mubr.f32.gmra.mrb[30].mxu0 %v2985_v49 }
 0x112   :  { %2314 = vmatprep.mubr.msk.f32.mxu0 %vm2631_vm1, %v2632_v8 }
 0x113   :  { %2063 = vmatmul.mubr.f32.gmra.mrb[30].mxu1 %v2994_v60 }
 0x114   :  { %2065 = vmatprep.mubr.msk.f32.mxu1 %vm2631_vm1, %v2632_v8 }
 0x115   :  { %2315 = vmatmul.mubr.f32.gmra.mrb[32].mxu0 %v2997_v5 }
 0x116   :  { %2317 = vmatprep.mubr.msk.f32.mxu0 %vm2631_vm1, %v2632_v8 }
 0x117   :  { %2066 = vmatmul.mubr.f32.gmra.mrb[32].mxu1 %v3010_v26 }
 0x118   :  { %2068 = vmatprep.mubr.msk.f32.mxu1 %vm2631_vm1, %v2632_v8 }
 0x119   :  { %2318 = vmatmul.mubr.f32.gmra.mrb[34].mxu0 %v3004_v2 }
 0x11a   :  { %2320 = vmatprep.mubr.msk.f32.mxu0 %vm2631_vm1, %v2632_v8 }
 0x11b   :  { %2069 = vmatmul.mubr.f32.gmra.mrb[34].mxu1 %v3023_v39 }
 0x11c   :  { %2071 = vmatprep.mubr.msk.f32.mxu1 %vm2631_vm1, %v2632_v8 }
 0x11d   :  { %2321 = vmatmul.mubr.f32.gmra.mrb[36].mxu0 %v3017_v11 }
 0x11e   :  { %2323 = vmatprep.mubr.msk.f32.mxu0 %vm2631_vm1, %v2632_v8 }
 0x11f   :  { %2072 = vmatmul.mubr.f32.gmra.mrb[36].mxu1 %v3036_v40 }
 0x120   :  { %2074 = vmatprep.mubr.msk.f32.mxu1 %vm2631_vm1, %v2632_v8 }
 0x121   :  { %2324 = vmatmul.mubr.f32.gmra.mrb[38].mxu0 %v3030_v44 }
 0x122   :  { %2326 = vmatprep.mubr.msk.f32.mxu0 %vm2631_vm1, %v2632_v8 }
 0x123   :  { %2075 = vmatmul.mubr.f32.gmra.mrb[38].mxu1 %v3585_v17 }
 0x124   :  { %2077 = vmatprep.mubr.msk.f32.mxu1 %vm2631_vm1, %v2632_v8 }
 0x125   :  { %2327 = vmatmul.mubr.f32.gmra.mrb[40].mxu0 %v3049_v53 }
 0x126   :  { %2329 = vmatprep.mubr.msk.f32.mxu0 %vm2631_vm1, %v2632_v8 }
 0x127   :  { %2078 = vmatmul.mubr.f32.gmra.mrb[40].mxu1 %v3586_v18 }
 0x128   :  { %2080 = vmatprep.mubr.msk.f32.mxu1 %vm2631_vm1, %v2632_v8 }
 0x129   :  { %2330 = vmatmul.mubr.f32.gmra.mrb[42].mxu0 %v3062_v36 }
 0x12a   :  { %2332 = vmatprep.mubr.msk.f32.mxu0 %vm2631_vm1, %v2632_v8 }
 0x12b   :  { %2081 = vmatmul.mubr.f32.gmra.mrb[42].mxu1 %v3587_v19 }
 0x12c   :  { %2083 = vmatprep.mubr.msk.f32.mxu1 %vm2631_vm1, %v2632_v8 }
 0x12d   :  { %2333 = vmatmul.mubr.f32.gmra.mrb[44].mxu0 %v3075_v0  ;;  %v3443_v0 = vstv %s3572_s2 }
 0x12e   :  { %2335 = vmatprep.mubr.msk.f32.mxu0 %vm2631_vm1, %v2632_v8 }
 0x12f   :  { %2084 = vmatmul.mubr.f32.gmra.mrb[44].mxu1 %v3085_v10 }
 0x130   :  { %2086 = vmatprep.mubr.msk.f32.mxu1 %vm2631_vm1, %v2632_v8 }
 0x131   :  { %2336 = vmatmul.mubr.f32.gmra.mrb[46].mxu0 %v3088_v58 }
 0x132   :  { %2338 = vmatprep.mubr.msk.f32.mxu0 %vm2631_vm1, %v2632_v8 }
 0x133   :  { %2087 = vmatmul.mubr.f32.gmra.mrb[46].mxu1 %v3101_v7 }
 0x134   :  { %2089 = vmatprep.mubr.msk.f32.mxu1 %vm2631_vm1, %v2632_v8 }
 0x135   :  { %2339 = vmatmul.mubr.f32.gmra.mrb[48].mxu0 %v3095_v48 }
 0x137   :  { %2090 = vmatmul.mubr.f32.gmra.mrb[48].mxu1 %v3111_v63 }
 0x1a8   :  { %v1491_v20 = vpop.f32.mrb[0].mxu0 }
 0x1a9   :  { %v2268_v21 = vpop.f32.mrb[1].mxu0 }
 0x1aa   :  { %v752_v27 = vpop.f32.mrb[0].mxu1 }
 0x1ab   :  { %v2377_v28 = vadd.f32 %v752_v27, %v3443_v0  ;;  %v2019_v29 = vpop.f32.mrb[1].mxu1 }
 0x1ac   :  { %v1497_v30 = vpop.f32.mrb[2].mxu0 }
 0x1ad   :  { %v2378_v37 = vadd.f32 %v2377_v28, %v1491_v20  ;;  %v2271_v41 = vpop.f32.mrb[3].mxu0 }
 0x1ae   :  { %v759_v8 = vpop.f32.mrb[2].mxu1 }
 0x1af   :  { %1640 = vst.msk [vmem:[%s3573_s3] sm:$0xff] %vm1639_vm2, %v2378_v37  ;;  %v2379_v42 = vadd.f32 %v759_v8, %v3443_v0  ;;  %v2022_v51 = vpop.f32.mrb[3].mxu1 }
 0x1b0   :  { %v1503_v54 = vpop.f32.mrb[4].mxu0 }
 0x1b1   :  { %v2380_v57 = vadd.f32 %v2379_v42, %v1497_v30  ;;  %v2274_v61 = vpop.f32.mrb[5].mxu0 }
 0x1b2   :  { %v766_v62 = vpop.f32.mrb[4].mxu1 }
 0x1b3   :  { %1641 = vst.msk [vmem:[%s3573_s3 + $0x8] sm:$0xff] %vm1639_vm2, %v2380_v57  ;;  %v2381_v1 = vadd.f32 %v766_v62, %v3443_v0  ;;  %v2025_v4 = vpop.f32.mrb[5].mxu1 }
 0x1b4   :  { %v1509_v9 = vpop.f32.mrb[6].mxu0 }
 0x1b5   :  { %v2382_v14 = vadd.f32 %v2381_v1, %v1503_v54  ;;  %v2277_v15 = vpop.f32.mrb[7].mxu0 }
 0x1b6   :  { %v773_v45 = vpop.f32.mrb[6].mxu1 }
 0x1b7   :  { %1642 = vst.msk [vmem:[%s3573_s3 + $0x10] sm:$0xff] %vm1639_vm2, %v2382_v14  ;;  %v2383_v50 = vadd.f32 %v773_v45, %v3443_v0  ;;  %v2028_v59 = vpop.f32.mrb[7].mxu1 }
 0x1b8   :  { %v1515_v6 = vpop.f32.mrb[8].mxu0 }
 0x1b9   :  { %v2384_v12 = vadd.f32 %v2383_v50, %v1509_v9  ;;  %v2280_v13 = vpop.f32.mrb[9].mxu0 }
 0x1ba   :  { %v780_v36 = vpop.f32.mrb[8].mxu1 }
 0x1bb   :  { %1643 = vst.msk [vmem:[%s3573_s3 + $0x18] sm:$0xff] %vm1639_vm2, %v2384_v12  ;;  %v2385_v38 = vadd.f32 %v780_v36, %v3443_v0  ;;  %v2031_v43 = vpop.f32.mrb[9].mxu1 }
 0x1bc   :  { %v1521_v55 = vpop.f32.mrb[10].mxu0 }
 0x1bd   :  { %v2386_v3 = vadd.f32 %v2385_v38, %v1515_v6  ;;  %v2283_v24 = vpop.f32.mrb[11].mxu0 }
 0x1be   :  { %v787_v25 = vpop.f32.mrb[10].mxu1 }
 0x1bf   :  { %1644 = vst.msk [vmem:[%s3573_s3 + $0x20] sm:$0xff] %vm1639_vm2, %v2386_v3  ;;  %v2387_v46 = vadd.f32 %v787_v25, %v3443_v0  ;;  %v2034_v49 = vpop.f32.mrb[11].mxu1 }
 0x1c0   :  { %v1527_v60 = vpop.f32.mrb[12].mxu0 }
 0x1c1   :  { %v2388_v5 = vadd.f32 %v2387_v46, %v1521_v55  ;;  %v2286_v2 = vpop.f32.mrb[13].mxu0 }
 0x1c2   :  { %v794_v26 = vpop.f32.mrb[12].mxu1 }
 0x1c3   :  { %1645 = vst.msk [vmem:[%s3573_s3 + $0x28] sm:$0xff] %vm1639_vm2, %v2388_v5  ;;  %v2389_v11 = vadd.f32 %v794_v26, %v3443_v0  ;;  %v2037_v39 = vpop.f32.mrb[13].mxu1 }
 0x1c4   :  { %v1533_v44 = vpop.f32.mrb[14].mxu0 }
 0x1c5   :  { %v2390_v40 = vadd.f32 %v2389_v11, %v1527_v60  ;;  %v2289_v58 = vpop.f32.mrb[15].mxu0 }
 0x1c6   :  { %v801_v53 = vpop.f32.mrb[14].mxu1 }
 0x1c7   :  { %1646 = vst.msk [vmem:[%s3573_s3 + $0x30] sm:$0xff] %vm1639_vm2, %v2390_v40  ;;  %v2391_v7 = vadd.f32 %v801_v53, %v3443_v0  ;;  %v2040_v63 = vpop.f32.mrb[15].mxu1 }
 0x1c8   :  { %v1539_v10 = vpop.f32.mrb[16].mxu0 }
 0x1c9   :  { %v2392_v48 = vadd.f32 %v2391_v7, %v1533_v44  ;;  %v2292_v22 = vpop.f32.mrb[17].mxu0 }
 0x1ca   :  { %v808_v56 = vpop.f32.mrb[16].mxu1 }
 0x1cb   :  { %1647 = vst.msk [vmem:[%s3573_s3 + $0x38] sm:$0xff] %vm1639_vm2, %v2392_v48  ;;  %v2393_v34 = vadd.f32 %v808_v56, %v3443_v0  ;;  %v2043_v33 = vpop.f32.mrb[17].mxu1 }
 0x1cc   :  { %v1545_v47 = vpop.f32.mrb[18].mxu0 }
 0x1cd   :  { %v2394_v35 = vadd.f32 %v2393_v34, %v1539_v10  ;;  %v2295_v52 = vpop.f32.mrb[19].mxu0 }
 0x1ce   :  { %v815_v31 = vpop.f32.mrb[18].mxu1 }
 0x1cf   :  { %1648 = vst.msk [vmem:[%s3573_s3 + $0x40] sm:$0xff] %vm1639_vm2, %v2394_v35  ;;  %v2395_v32 = vadd.f32 %v815_v31, %v3443_v0  ;;  %v2046_v23 = vpop.f32.mrb[19].mxu1 }
 0x1d0   :  { %v1551_v16 = vpop.f32.mrb[20].mxu0 }
 0x1d1   :  { %v2396_v17 = vadd.f32 %v2395_v32, %v1545_v47  ;;  %v2298_v18 = vpop.f32.mrb[21].mxu0 }
 0x1d2   :  { %v822_v19 = vpop.f32.mrb[20].mxu1 }
 0x1d3   :  { %1649 = vst.msk [vmem:[%s3573_s3 + $0x48] sm:$0xff] %vm1639_vm2, %v2396_v17  ;;  %v2397_v20 = vadd.f32 %v822_v19, %v3443_v0  ;;  %v2049_v21 = vpop.f32.mrb[21].mxu1 }
 0x1d4   :  { %v1557_v27 = vpop.f32.mrb[22].mxu0 }
 0x1d5   :  { %v2398_v28 = vadd.f32 %v2397_v20, %v1551_v16  ;;  %v2301_v29 = vpop.f32.mrb[23].mxu0 }
 0x1d6   :  { %v829_v30 = vpop.f32.mrb[22].mxu1 }
 0x1d7   :  { %1650 = vst.msk [vmem:[%s3573_s3 + $0x50] sm:$0xff] %vm1639_vm2, %v2398_v28  ;;  %v2399_v37 = vadd.f32 %v829_v30, %v3443_v0  ;;  %v2052_v41 = vpop.f32.mrb[23].mxu1 }
 0x1d8   :  { %v1563_v8 = vpop.f32.mrb[24].mxu0 }
 0x1d9   :  { %v2400_v42 = vadd.f32 %v2399_v37, %v1557_v27  ;;  %v2304_v51 = vpop.f32.mrb[25].mxu0 }
 0x1da   :  { %v836_v54 = vpop.f32.mrb[24].mxu1 }
 0x1db   :  { %1651 = vst.msk [vmem:[%s3573_s3 + $0x58] sm:$0xff] %vm1639_vm2, %v2400_v42  ;;  %v2401_v57 = vadd.f32 %v836_v54, %v3443_v0  ;;  %v2055_v61 = vpop.f32.mrb[25].mxu1 }
 0x1dc   :  { %v1569_v62 = vpop.f32.mrb[26].mxu0 }
 0x1dd   :  { %v2402_v1 = vadd.f32 %v2401_v57, %v1563_v8  ;;  %v2307_v4 = vpop.f32.mrb[27].mxu0 }
 0x1de   :  { %v843_v9 = vpop.f32.mrb[26].mxu1 }
 0x1df   :  { %1652 = vst.msk [vmem:[%s3573_s3 + $0x60] sm:$0xff] %vm1639_vm2, %v2402_v1  ;;  %v2403_v14 = vadd.f32 %v843_v9, %v3443_v0  ;;  %v2058_v15 = vpop.f32.mrb[27].mxu1 }
 0x1e0   :  { %v1575_v45 = vpop.f32.mrb[28].mxu0 }
 0x1e1   :  { %v2404_v50 = vadd.f32 %v2403_v14, %v1569_v62  ;;  %v2310_v59 = vpop.f32.mrb[29].mxu0 }
 0x1e2   :  { %v850_v6 = vpop.f32.mrb[28].mxu1 }
 0x1e3   :  { %1653 = vst.msk [vmem:[%s3573_s3 + $0x68] sm:$0xff] %vm1639_vm2, %v2404_v50  ;;  %v2405_v12 = vadd.f32 %v850_v6, %v3443_v0  ;;  %v2061_v13 = vpop.f32.mrb[29].mxu1 }
 0x1e4   :  { %v1581_v36 = vpop.f32.mrb[30].mxu0 }
 0x1e5   :  { %v2406_v38 = vadd.f32 %v2405_v12, %v1575_v45  ;;  %v2313_v43 = vpop.f32.mrb[31].mxu0 }
 0x1e6   :  { %v857_v55 = vpop.f32.mrb[30].mxu1 }
 0x1e7   :  { %1654 = vst.msk [vmem:[%s3573_s3 + $0x70] sm:$0xff] %vm1639_vm2, %v2406_v38  ;;  %v2407_v3 = vadd.f32 %v857_v55, %v3443_v0  ;;  %v2064_v24 = vpop.f32.mrb[31].mxu1 }
 0x1e8   :  { %v1587_v25 = vpop.f32.mrb[32].mxu0 }
 0x1e9   :  { %v2408_v46 = vadd.f32 %v2407_v3, %v1581_v36  ;;  %v2316_v49 = vpop.f32.mrb[33].mxu0 }
 0x1ea   :  { %v864_v60 = vpop.f32.mrb[32].mxu1 }
 0x1eb   :  { %1655 = vst.msk [vmem:[%s3573_s3 + $0x78] sm:$0xff] %vm1639_vm2, %v2408_v46  ;;  %v2409_v5 = vadd.f32 %v864_v60, %v3443_v0  ;;  %v2067_v2 = vpop.f32.mrb[33].mxu1 }
 0x1ec   :  { %v1593_v26 = vpop.f32.mrb[34].mxu0 }
 0x1ed   :  { %v2410_v11 = vadd.f32 %v2409_v5, %v1587_v25  ;;  %v2319_v39 = vpop.f32.mrb[35].mxu0 }
 0x1ee   :  { %v871_v44 = vpop.f32.mrb[34].mxu1 }
 0x1ef   :  { %1656 = vst.msk [vmem:[%s3573_s3 + $0x80] sm:$0xff] %vm1639_vm2, %v2410_v11  ;;  %v2411_v40 = vadd.f32 %v871_v44, %v3443_v0  ;;  %v2070_v58 = vpop.f32.mrb[35].mxu1 }
 0x1f0   :  { %v1599_v53 = vpop.f32.mrb[36].mxu0 }
 0x1f1   :  { %v2412_v7 = vadd.f32 %v2411_v40, %v1593_v26  ;;  %v2322_v63 = vpop.f32.mrb[37].mxu0 }
 0x1f2   :  { %v878_v10 = vpop.f32.mrb[36].mxu1 }
 0x1f3   :  { %1657 = vst.msk [vmem:[%s3573_s3 + $0x88] sm:$0xff] %vm1639_vm2, %v2412_v7  ;;  %v2413_v48 = vadd.f32 %v878_v10, %v3443_v0  ;;  %v2073_v22 = vpop.f32.mrb[37].mxu1 }
 0x1f4   :  { %v1605_v56 = vpop.f32.mrb[38].mxu0 }
 0x1f5   :  { %v2414_v34 = vadd.f32 %v2413_v48, %v1599_v53  ;;  %v2325_v33 = vpop.f32.mrb[39].mxu0 }
 0x1f6   :  { %v885_v47 = vpop.f32.mrb[38].mxu1 }
 0x1f7   :  { %1658 = vst.msk [vmem:[%s3573_s3 + $0x90] sm:$0xff] %vm1639_vm2, %v2414_v34  ;;  %v2415_v35 = vadd.f32 %v885_v47, %v3443_v0  ;;  %v2076_v52 = vpop.f32.mrb[39].mxu1 }
 0x1f8   :  { %v1611_v31 = vpop.f32.mrb[40].mxu0 }
 0x1f9   :  { %v2416_v32 = vadd.f32 %v2415_v35, %v1605_v56  ;;  %v2328_v23 = vpop.f32.mrb[41].mxu0 }
 0x1fa   :  { %v892_v16 = vpop.f32.mrb[40].mxu1 }
 0x1fb   :  { %1659 = vst.msk [vmem:[%s3573_s3 + $0x98] sm:$0xff] %vm1639_vm2, %v2416_v32  ;;  %v2417_v17 = vadd.f32 %v892_v16, %v3443_v0  ;;  %v2079_v18 = vpop.f32.mrb[41].mxu1 }
 0x1fc   :  { %v1617_v19 = vpop.f32.mrb[42].mxu0 }
 0x1fd   :  { %v2418_v20 = vadd.f32 %v2417_v17, %v1611_v31  ;;  %v2331_v21 = vpop.f32.mrb[43].mxu0 }
 0x1fe   :  { %v899_v27 = vpop.f32.mrb[42].mxu1 }
 0x1ff   :  { %1660 = vst.msk [vmem:[%s3573_s3 + $0xa0] sm:$0xff] %vm1639_vm2, %v2418_v20  ;;  %v2419_v28 = vadd.f32 %v899_v27, %v3443_v0  ;;  %v2082_v29 = vpop.f32.mrb[43].mxu1 }
 0x200   :  { %v1623_v30 = vpop.f32.mrb[44].mxu0 }
 0x201   :  { %v2420_v37 = vadd.f32 %v2419_v28, %v1617_v19  ;;  %v2334_v41 = vpop.f32.mrb[45].mxu0 }
 0x202   :  { %v906_v8 = vpop.f32.mrb[44].mxu1 }
 0x203   :  { %1661 = vst.msk [vmem:[%s3573_s3 + $0xa8] sm:$0xff] %vm1639_vm2, %v2420_v37  ;;  %v2421_v42 = vadd.f32 %v906_v8, %v3443_v0  ;;  %v2085_v51 = vpop.f32.mrb[45].mxu1 }
 0x204   :  { %v1629_v54 = vpop.f32.mrb[46].mxu0 }
 0x205   :  { %v2422_v57 = vadd.f32 %v2421_v42, %v1623_v30  ;;  %v2337_v61 = vpop.f32.mrb[47].mxu0 }
 0x206   :  { %v913_v62 = vpop.f32.mrb[46].mxu1 }
 0x207   :  { %1662 = vst.msk [vmem:[%s3573_s3 + $0xb0] sm:$0xff] %vm1639_vm2, %v2422_v57  ;;  %v2423_v1 = vadd.f32 %v913_v62, %v3443_v0  ;;  %v2088_v4 = vpop.f32.mrb[47].mxu1 }
 0x208   :  { %v1635_v9 = vpop.f32.mrb[48].mxu0 }
 0x209   :  { %v2424_v14 = vadd.f32 %v2423_v1, %v1629_v54  ;;  %v2340_v15 = vpop.f32.mrb[49].mxu0 }
 0x20a   :  { %v920_v45 = vpop.f32.mrb[48].mxu1 }
 0x20b   :  { %1663 = vst.msk [vmem:[%s3573_s3 + $0xb8] sm:$0xff] %vm1639_vm2, %v2424_v14  ;;  %v2425_v50 = vadd.f32 %v920_v45, %v3443_v0  ;;  %v2091_v59 = vpop.f32.mrb[49].mxu1 }
 0x20d   :  { %v2426_v6 = vadd.f32 %v2425_v50, %v1635_v9 }
 0x20f   :  { %1664 = vst.msk [vmem:[%s3573_s3 + $0xc0] sm:$0xff] %vm1639_vm2, %v2426_v6 }

</bundles_post_ra>
